<compile_context>
chip_gen: v6e
topology: v6e:2x2x1
jax: 0.10.0
libtpu: 0.0.40
codegen_flags: <defaults>
</compile_context>

<pallas_src>
import jax
import jax.numpy as jnp
from jax.experimental import pallas as pl
from jax.experimental.pallas import tpu as pltpu


# ---------------------------------------------------------------------------
# Shared RNG helpers (used identically by the kernel and the pure-JAX reference)
# ---------------------------------------------------------------------------
def _mix32(x):
    """splitmix32-style avalanche on uint32."""
    x = (x ^ (x >> jnp.uint32(16))) * jnp.uint32(0x7FEB352D)
    x = (x ^ (x >> jnp.uint32(15))) * jnp.uint32(0x846CA68B)
    return x ^ (x >> jnp.uint32(16))


def _bits_to_unit_float(bits):
    """uint32 bits -> uniform float32 in [0, 1) via the mantissa trick."""
    mant = (bits >> jnp.uint32(9)) | jnp.uint32(0x3F800000)   # [1, 2)
    return jax.lax.bitcast_convert_type(mant, jnp.float32) - 1.0


_ROW_SALT = 0x01000193   # FNV prime
_SEED_SALT = 0x9E3779B9  # golden ratio
_PLANE_SALT = 0x5BD1E995 # decorrelates the "sizes" stream from the "centers" one


# ---------------------------------------------------------------------------
# Kernel
# ---------------------------------------------------------------------------
def _proposal_kernel(seed_ref, scale_ref, out_ref):
    # seed_ref : SMEM (1,)        int32
    # scale_ref: VMEM (2B, 1)     float32, rows = [w0, h0, w1, h1, ...]
    # out_ref  : VMEM (2, 2B, Nb) float32, plane 0 = (x0,y0) rows, plane 1 = (x1,y1) rows
    two_b = scale_ref.shape[0]
    block_n = out_ref.shape[-1]

    col0 = pl.program_id(0) * block_n  # global lane offset of this N-tile
    rows = jax.lax.broadcasted_iota(jnp.int32, (two_b, block_n), 0).astype(jnp.uint32)
    cols = (jax.lax.broadcasted_iota(jnp.int32, (two_b, block_n), 1) + col0).astype(jnp.uint32)
    seed_u = seed_ref[0].astype(jnp.uint32)

    base = rows * jnp.uint32(_ROW_SALT) + cols + seed_u * jnp.uint32(_SEED_SALT)

    # centers ~ U[0,1): rows alternate cx_b, cy_b;  s ~ U[0,1): raw widths/heights
    centers = _bits_to_unit_float(_mix32(base))
    s = _bits_to_unit_float(_mix32(base ^ jnp.uint32(_PLANE_SALT)))

    # 0.5 * s**5 via square-and-multiply (3 full-width vmuls)
    t = s * s
    half = 0.5 * (t * t * s)

    scale = scale_ref[...]                       # (2B, 1): lane-broadcast [w; h; w; h; ...]
    out_ref[0, :, :] = (centers - half) * scale  # x0 / y0 rows
    out_ref[1, :, :] = (centers + half) * scale  # x1 / y1 rows


# ---------------------------------------------------------------------------
# Wrapper (PyTorch-forward semantics)
# ---------------------------------------------------------------------------
def inference_proposal_boxes(num_proposal_boxes, batched_inputs, seed=0):
    """Adds 'proposal_boxes' of shape (num_proposal_boxes, 4) to every dict."""
    batch = len(batched_inputs)
    two_b = 2 * batch

    wh = []
    for bi in batched_inputs:
        h, w = bi["image"].shape[-2:]
        wh.append((float(w), float(h)))          # scale order is [w, h, w, h]

    # lane-dense output: pad N up to a multiple of 128 and tile large N
    n_round = ((num_proposal_boxes + 127) // 128) * 128
    block_n = min(n_round, 32 * 1024)
    num_blocks = pl.cdiv(n_round, block_n)
    n_pad = num_blocks * block_n

    scale = jnp.asarray([v for p in wh for v in p], dtype=jnp.float32).reshape(two_b, 1)
    seed_arr = jnp.asarray([seed], dtype=jnp.int32)

    out = pl.pallas_call(
        _proposal_kernel,
        out_shape=jax.ShapeDtypeStruct((2, two_b, n_pad), jnp.float32),
        grid=(num_blocks,),
        in_specs=[
            pl.BlockSpec((1,), lambda i: (0,), memory_space=pltpu.MemorySpace.SMEM),
            pl.BlockSpec((two_b, 1), lambda i: (0, 0)),
        ],
        out_specs=pl.BlockSpec((2, two_b, block_n), lambda i: (0, 0, i)),
        compiler_params=pltpu.CompilerParams(dimension_semantics=("parallel",)),
    )(seed_arr, scale)

    # (2, 2B, N) -> (B, N, 4) once for the whole batch, last dim = [x0, y0, x1, y1]
    out = out[:, :, :num_proposal_boxes]
    boxes = jnp.transpose(
        out.reshape(2, batch, 2, num_proposal_boxes), (1, 3, 0, 2)
    ).reshape(batch, num_proposal_boxes, 4)

    for i, bi in enumerate(batched_inputs):
        bi["proposal_boxes"] = boxes[i]
    return batched_inputs


# ---------------------------------------------------------------------------
# Pure-JAX reference (identical math) for the self-test
# ---------------------------------------------------------------------------
def _reference_boxes(num, wh, seed):
    batch = len(wh)
    two_b = 2 * batch
    rows = jax.lax.broadcasted_iota(jnp.int32, (two_b, num), 0).astype(jnp.uint32)
    cols = jax.lax.broadcasted_iota(jnp.int32, (two_b, num), 1).astype(jnp.uint32)
    base = rows * jnp.uint32(_ROW_SALT) + cols + jnp.uint32(seed) * jnp.uint32(_SEED_SALT)
    centers = _bits_to_unit_float(_mix32(base))
    s = _bits_to_unit_float(_mix32(base ^ jnp.uint32(_PLANE_SALT)))
    t = s * s
    half = 0.5 * (t * t * s)
    scale = jnp.asarray([v for p in wh for v in p], jnp.float32).reshape(two_b, 1)
    lo = (centers - half) * scale
    hi = (centers + half) * scale
    out = jnp.stack([lo, hi], axis=0)
    return jnp.transpose(out.reshape(2, batch, 2, num), (1, 3, 0, 2)).reshape(batch, num, 4)


if __name__ == "__main__":
    key = jax.random.PRNGKey(0)
    k0, k1 = jax.random.split(key)

    num_proposal_boxes = 128
    batched_inputs = [
        {"image": jax.random.normal(k0, (3, 16, 16), dtype=jnp.float32),
         "height": 16, "width": 16},
        {"image": jax.random.normal(k1, (3, 24, 32), dtype=jnp.float32),
         "height": 24, "width": 32},
    ]

    batched_inputs = inference_proposal_boxes(num_proposal_boxes, batched_inputs, seed=0)
    boxes = [jax.block_until_ready(bi["proposal_boxes"]) for bi in batched_inputs]

    wh = [(float(bi["image"].shape[-1]), float(bi["image"].shape[-2]))
          for bi in batched_inputs]
    ref = jax.block_until_ready(_reference_boxes(num_proposal_boxes, wh, 0))

    for i, b in enumerate(boxes):
        w_i, h_i = wh[i]
        assert b.shape == (num_proposal_boxes, 4)
        assert b.dtype == jnp.float32
        assert bool(jnp.all(jnp.isfinite(b)))
        # xyxy ordering (w, h >= 0)
        assert bool(jnp.all(b[:, 2] >= b[:, 0]))
        assert bool(jnp.all(b[:, 3] >= b[:, 1]))
        # reference (unclamped) boxes live in [-0.5, 1.5] x image extent
        assert bool(jnp.all(b[:, 0] >= -0.5 * w_i - 1e-3))
        assert bool(jnp.all(b[:, 2] <= 1.5 * w_i + 1e-3))
        assert bool(jnp.all(b[:, 1] >= -0.5 * h_i - 1e-3))
        assert bool(jnp.all(b[:, 3] <= 1.5 * h_i + 1e-3))
        # exact-math cross-check against the pure-JAX reference
        assert bool(jnp.allclose(b, ref[i], rtol=1e-5, atol=1e-3))

    print("KERNEL_OK")
</pallas_src>

<mosaic_0001>
module attributes {stable_mosaic.version = 11 : i64} {
  func.func @_proposal_kernel(%arg0: i32, %arg1: memref<1xi32, #tpu.memory_space<smem>>, %arg2: memref<4x1xf32, #tpu.memory_space<vmem>>, %arg3: memref<2x4x128xf32, #tpu.memory_space<vmem>>) attributes {dimension_semantics = [#tpu.dimension_semantics<parallel>], iteration_bounds = array<i64: 1>, scalar_prefetch = 0 : i64, scratch_operands = 0 : i64, tpu.core_type = #tpu.core_type<tc>, window_params = [{transform_indices = @transform_0, window_bounds = array<i64: 1>}, {pipeline_mode = #tpu.pipeline_mode<synchronous>, transform_indices = @transform_1, window_bounds = array<i64: 4, 1>}, {transform_indices = @transform_2, window_bounds = array<i64: 2, 4, 128>}]} {
    %c128_i32 = arith.constant 128 : i32
    %0 = arith.muli %arg0, %c128_i32 : i32
    %1 = tpu.iota {dimensions = array<i32: 0>} : vector<4x128xi32>
    %2 = tpu.iota {dimensions = array<i32: 1>} : vector<4x128xi32>
    %3 = vector.broadcast %0 : i32 to vector<4x128xi32>
    %4 = arith.addi %2, %3 : vector<4x128xi32>
    %c0 = arith.constant 0 : index
    %5 = memref.load %arg1[%c0] : memref<1xi32, #tpu.memory_space<smem>>
    %c16777619_i32 = arith.constant 16777619 : i32
    %6 = vector.broadcast %c16777619_i32 : i32 to vector<4x128xi32>
    %7 = arith.muli %1, %6 : vector<4x128xi32>
    %8 = arith.addi %7, %4 : vector<4x128xi32>
    %c-1640531527_i32 = arith.constant -1640531527 : i32
    %9 = arith.muli %5, %c-1640531527_i32 : i32
    %10 = vector.broadcast %9 : i32 to vector<4x128xi32>
    %11 = arith.addi %8, %10 : vector<4x128xi32>
    %c16_i32 = arith.constant 16 : i32
    %12 = vector.broadcast %c16_i32 : i32 to vector<4x128xi32>
    %13 = arith.shrui %11, %12 : vector<4x128xi32>
    %14 = arith.xori %11, %13 : vector<4x128xi32>
    %c2146121005_i32 = arith.constant 2146121005 : i32
    %15 = vector.broadcast %c2146121005_i32 : i32 to vector<4x128xi32>
    %16 = arith.muli %14, %15 : vector<4x128xi32>
    %c15_i32 = arith.constant 15 : i32
    %17 = vector.broadcast %c15_i32 : i32 to vector<4x128xi32>
    %18 = arith.shrui %16, %17 : vector<4x128xi32>
    %19 = arith.xori %16, %18 : vector<4x128xi32>
    %c-2073254261_i32 = arith.constant -2073254261 : i32
    %20 = vector.broadcast %c-2073254261_i32 : i32 to vector<4x128xi32>
    %21 = arith.muli %19, %20 : vector<4x128xi32>
    %c16_i32_0 = arith.constant 16 : i32
    %22 = vector.broadcast %c16_i32_0 : i32 to vector<4x128xi32>
    %23 = arith.shrui %21, %22 : vector<4x128xi32>
    %24 = arith.xori %21, %23 : vector<4x128xi32>
    %c9_i32 = arith.constant 9 : i32
    %25 = vector.broadcast %c9_i32 : i32 to vector<4x128xi32>
    %26 = arith.shrui %24, %25 : vector<4x128xi32>
    %c1065353216_i32 = arith.constant 1065353216 : i32
    %27 = vector.broadcast %c1065353216_i32 : i32 to vector<4x128xi32>
    %28 = arith.ori %26, %27 : vector<4x128xi32>
    %29 = tpu.bitcast %28 : vector<4x128xi32> -> vector<4x128xf32>
    %cst = arith.constant 1.000000e+00 : f32
    %30 = vector.broadcast %cst : f32 to vector<4x128xf32>
    %31 = arith.subf %29, %30 : vector<4x128xf32>
    %c1540483477_i32 = arith.constant 1540483477 : i32
    %32 = vector.broadcast %c1540483477_i32 : i32 to vector<4x128xi32>
    %33 = arith.xori %11, %32 : vector<4x128xi32>
    %c16_i32_1 = arith.constant 16 : i32
    %34 = vector.broadcast %c16_i32_1 : i32 to vector<4x128xi32>
    %35 = arith.shrui %33, %34 : vector<4x128xi32>
    %36 = arith.xori %33, %35 : vector<4x128xi32>
    %c2146121005_i32_2 = arith.constant 2146121005 : i32
    %37 = vector.broadcast %c2146121005_i32_2 : i32 to vector<4x128xi32>
    %38 = arith.muli %36, %37 : vector<4x128xi32>
    %c15_i32_3 = arith.constant 15 : i32
    %39 = vector.broadcast %c15_i32_3 : i32 to vector<4x128xi32>
    %40 = arith.shrui %38, %39 : vector<4x128xi32>
    %41 = arith.xori %38, %40 : vector<4x128xi32>
    %c-2073254261_i32_4 = arith.constant -2073254261 : i32
    %42 = vector.broadcast %c-2073254261_i32_4 : i32 to vector<4x128xi32>
    %43 = arith.muli %41, %42 : vector<4x128xi32>
    %c16_i32_5 = arith.constant 16 : i32
    %44 = vector.broadcast %c16_i32_5 : i32 to vector<4x128xi32>
    %45 = arith.shrui %43, %44 : vector<4x128xi32>
    %46 = arith.xori %43, %45 : vector<4x128xi32>
    %c9_i32_6 = arith.constant 9 : i32
    %47 = vector.broadcast %c9_i32_6 : i32 to vector<4x128xi32>
    %48 = arith.shrui %46, %47 : vector<4x128xi32>
    %c1065353216_i32_7 = arith.constant 1065353216 : i32
    %49 = vector.broadcast %c1065353216_i32_7 : i32 to vector<4x128xi32>
    %50 = arith.ori %48, %49 : vector<4x128xi32>
    %51 = tpu.bitcast %50 : vector<4x128xi32> -> vector<4x128xf32>
    %cst_8 = arith.constant 1.000000e+00 : f32
    %52 = vector.broadcast %cst_8 : f32 to vector<4x128xf32>
    %53 = arith.subf %51, %52 : vector<4x128xf32>
    %54 = arith.mulf %53, %53 : vector<4x128xf32>
    %55 = arith.mulf %54, %54 : vector<4x128xf32>
    %56 = arith.mulf %55, %53 : vector<4x128xf32>
    %cst_9 = arith.constant 5.000000e-01 : f32
    %57 = vector.broadcast %cst_9 : f32 to vector<4x128xf32>
    %58 = arith.mulf %57, %56 : vector<4x128xf32>
    %c0_10 = arith.constant 0 : index
    %c0_11 = arith.constant 0 : index
    %59 = vector.load %arg2[%c0_10, %c0_11] : memref<4x1xf32, #tpu.memory_space<vmem>>, vector<4x1xf32>
    %60 = arith.subf %31, %58 : vector<4x128xf32>
    %61 = vector.broadcast %59 : vector<4x1xf32> to vector<4x128xf32>
    %62 = arith.mulf %60, %61 : vector<4x128xf32>
    %c0_12 = arith.constant 0 : index
    %c0_13 = arith.constant 0 : index
    %c0_14 = arith.constant 0 : index
    %63 = vector.load %arg3[%c0_12, %c0_13, %c0_14] : memref<2x4x128xf32, #tpu.memory_space<vmem>>, vector<1x4x128xf32>
    %64 = vector.shape_cast %63 : vector<1x4x128xf32> to vector<4x128xf32>
    %65 = vector.shape_cast %62 : vector<4x128xf32> to vector<1x4x128xf32>
    tpu.vector_store %arg3[%c0_12, %c0_13, %c0_14], %65 {strides = array<i32>} : memref<2x4x128xf32, #tpu.memory_space<vmem>>, vector<1x4x128xf32>,
    %66 = arith.addf %31, %58 : vector<4x128xf32>
    %67 = vector.broadcast %59 : vector<4x1xf32> to vector<4x128xf32>
    %68 = arith.mulf %66, %67 : vector<4x128xf32>
    %c1 = arith.constant 1 : index
    %c0_15 = arith.constant 0 : index
    %c0_16 = arith.constant 0 : index
    %69 = vector.load %arg3[%c1, %c0_15, %c0_16] : memref<2x4x128xf32, #tpu.memory_space<vmem>>, vector<1x4x128xf32>
    %70 = vector.shape_cast %69 : vector<1x4x128xf32> to vector<4x128xf32>
    %71 = vector.shape_cast %68 : vector<4x128xf32> to vector<1x4x128xf32>
    tpu.vector_store %arg3[%c1, %c0_15, %c0_16], %71 {strides = array<i32>} : memref<2x4x128xf32, #tpu.memory_space<vmem>>, vector<1x4x128xf32>,
    return
  }
  func.func @transform_0(%arg0: i32) -> i32 {
    %c0_i32 = arith.constant 0 : i32
    %c0_i32_0 = arith.constant 0 : i32
    return %c0_i32 : i32
  }
  func.func @transform_1(%arg0: i32) -> (i32, i32) {
    %c0_i32 = arith.constant 0 : i32
    %c0_i32_0 = arith.constant 0 : i32
    %c0_i32_1 = arith.constant 0 : i32
    return %c0_i32, %c0_i32_0 : i32, i32
  }
  func.func @transform_2(%arg0: i32) -> (i32, i32, i32) {
    %c0_i32 = arith.constant 0 : i32
    %c0_i32_0 = arith.constant 0 : i32
    %c0_i32_1 = arith.constant 0 : i32
    return %c0_i32, %c0_i32_0, %arg0 : i32, i32, i32
  }
}

</mosaic_0001>

<bundles_post_ra>
// kernel: tpu_custom_call.1
= control target key start
LH: loop header
LB: loop body
LE: loop exit
PB: predicated region body
PF: predicated region fallthrough
CT: control target
= control target key end

     0   :  { %v113_v1 = vmov 0   ;;  %s141_s0 = inlined_call_operand.<no memory space> [shape: s32[1], index: 0, kind: input, shape index: {}]   ;;  %s142_s1 = inlined_call_operand.vmem [shape: f32[4,1], index: 1, kind: input, shape index: {}]   ;;  %s143_s2 = inlined_call_operand.hbm [shape: f32[2,4,128], index: 2, kind: output, shape index: {}]  }
   0x1   :  { %v55_v0 = vld [vmem:[%s142_s1] sm:$0xf]  ;;  %90 = vset.pattern.permute.xlu0 %v113_v1 }
   0x2   :  { %8 = vsyncpa [#allocation4], 0  ;;  %59 = vperm.xlu0 %90, %v55_v0   ;;  %v14_v2 = vlaneseq  ;;  %s23_s13 = smul.u32 2654435769, %s141_s0  ;;  %s114_s0 = smov [#allocation3]  }
   0x3   :  { %s73_s1 = sshll.u32 %s114_s0, 4  ;;  %s74_s1 = int_to_ptr.vmem [resolvable:$true] %s73_s1 }
   0x4   :  { %v15_v3 = vshrl.u32 %v14_v2, 7  ;;  %v17_v4 = vand.u32 127, %v14_v2  ;;  %v24_v7 = vstv %s23_s13  ;;  %s91_s14 = scalar_lea.vmem %s74_s1, 128  ;;  %p96_p1 = scmp.lt.s32.totalorder %s74_s1, %s74_s1 }
   0x5   :  { %p92_p0 = scmp.ne.s32.totalorder %s74_s1, %s91_s14  ;;  %p97_p2 = scmp.lt.s32.totalorder %s91_s14, %s91_s14 }
   0x6   :  { %v21_v5 = vmul.u32 16777619, %v15_v3 }
   0x7   :  { %p98_p3 = por %p97_p2, %p96_p1 }
   0x8   :  { %v22_v6 = vadd.s32 %v21_v5, %v17_v4 }
   0x9   :  { %p99_p4 = pnand %p98_p3, %p92_p0 }
   0xa   :  { %v25_v8 = vadd.s32 %v24_v7, %v22_v6 }
   0xc   :  { %v38_v9 = vxor.u32 1540483477, %v25_v8  ;;  %v26_v14 = vshrl.u32 %v25_v8, 16 }
   0xe   :  { %v39_v10 = vshrl.u32 %v38_v9, 16  ;;  %v27_v16 = vxor.u32 %v26_v14, %v25_v8 }
  0x10   :  { %v40_v11 = vxor.u32 %v39_v10, %v38_v9  ;;  %v28_v18 = vmul.u32 2146121005, %v27_v16 }
  0x12   :  { %v41_v12 = vmul.u32 2146121005, %v40_v11  ;;  %v29_v20 = vshrl.u32 %v28_v18, 15 }
  0x14   :  { %v42_v13 = vshrl.u32 %v41_v12, 15  ;;  %v30_v22 = vxor.u32 %v29_v20, %v28_v18 }
  0x16   :  { %v43_v15 = vxor.u32 %v42_v13, %v41_v12  ;;  %v31_v24 = vmul.u32 2221713035, %v30_v22 }
  0x18   :  { %v44_v17 = vmul.u32 2221713035, %v43_v15  ;;  %v32_v26 = vshrl.u32 %v31_v24, 16 }
  0x1a   :  { %v45_v19 = vshrl.u32 %v44_v17, 16  ;;  %v33_v28 = vxor.u32 %v32_v26, %v31_v24 }
  0x1c   :  { %v46_v21 = vxor.u32 %v45_v19, %v44_v17  ;;  %v34_v30 = vshrl.u32 %v33_v28, 9 }
  0x1e   :  { %v47_v23 = vshrl.u32 %v46_v21, 9  ;;  %v35_v32 = vor.u32 1065353216, %v34_v30 }
  0x20   :  { %v48_v25 = vor.u32 1065353216, %v47_v23  ;;  %v84_v34 = vadd.f32 -1.0, %v35_v32 }
  0x22   :  { %v85_v27 = vadd.f32 -1.0, %v48_v25 }
  0x24   :  { %v51_v29 = vmul.f32 %v85_v27, %v85_v27 }
  0x26   :  { %v52_v31 = vmul.f32 %v51_v29, %v51_v29 }
  0x28   :  { %v53_v33 = vmul.f32 %v85_v27, %v52_v31 }
  0x2a   :  { %v54_v35 = vmul.f32 0.5, %v53_v33 }
  0x2c   :  { %v56_v36 = vsub.f32 %v84_v34, %v54_v35  ;;  %v64_v37 = vadd.f32 %v84_v34, %v54_v35 }
  0x7d   :  { %v60_v38 = vpop.permute.xlu0 %59 }
  0x7e   :  { %v62_v39 = vmul.f32 %v60_v38, %v56_v36  ;;  %v65_v40 = vmul.f32 %v64_v37, %v60_v38 }
  0x80   :  { %63 = vst [vmem:[#allocation3] sm:$0xf] %v62_v39  ;;  %67 = vst [vmem:[#allocation3 + $0x4] sm:$0xf] %v65_v40 }
  0x81   :  { %102 = shalt.err (!%p99_p4)
}
  0x82   :  { %s115_s15 = smov 64   ;;  %s116_s16 = smov 4  }
  0x83   :  { %79 = dma.vmem_to_hbm [thread:$0]  %s74_s1, 128, %s143_s2, [#allocation4], %s115_s15, %s115_s15, %s116_s16  }
  0x84   :  { %111 = dma.done.wait [#allocation4], 128  }
  0x85   :  { %112 = vsyncadd [#allocation4], 4294967168 }
  0x86   :  { %83 = vsyncpa [#allocation4], 1 }

</bundles_post_ra>
